<compile_context>
chip_gen: v5e
topology: v5e:2x2
jax: 0.10.0
libtpu: 0.0.40
codegen_flags: <defaults>
</compile_context>

<pallas_src>
import jax
import jax.numpy as jnp
from jax.experimental import pallas as pl
from jax.experimental.pallas import tpu as pltpu

LN_EPS = 1e-5   # PyTorch nn.LayerNorm default eps
GN_EPS = 1e-5   # PyTorch nn.GroupNorm default eps


# ----------------------------------------------------------------------------
# Per-generation tuning (tile sizes + scoped VMEM limit).
# ----------------------------------------------------------------------------
def _select_tuning():
    vmem_cap = None
    try:
        info = pltpu.get_tpu_info()
        vmem_cap = getattr(info, "vmem_capacity_bytes", None)
    except Exception:
        vmem_cap = None
    if vmem_cap is not None and vmem_cap >= 100 * 1024 * 1024:
        # v5e / v6e: 128 MiB physical VMEM -> big double-buffered weight tiles.
        return dict(vmem_limit=96 * 1024 * 1024,
                    tk_lin0=2048, tk_mlp=2048, tk_lin1=1024)
    # v7x (64 MiB physical per TC) or unknown: stay under ~48 MiB scoped.
    return dict(vmem_limit=48 * 1024 * 1024,
                tk_lin0=1024, tk_mlp=1024, tk_lin1=512)


def _layernorm_silu(y, g, b):
    """f32 LayerNorm (biased variance, PyTorch semantics) + affine + SiLU."""
    mu = jnp.mean(y, axis=-1, keepdims=True)
    var = jnp.mean((y - mu) ** 2, axis=-1, keepdims=True)
    y = (y - mu) * jax.lax.rsqrt(var + LN_EPS)
    y = y * g + b
    return y * jax.nn.sigmoid(y)


# ----------------------------------------------------------------------------
# Kernel 1: lin0 = Linear(in_dim -> h, no bias) -> LayerNorm -> SiLU.
#           K-tiled reduction; f32 accumulation in the resident output block;
#           LN+SiLU epilogue on the last K step.
# ----------------------------------------------------------------------------
def _lin0_kernel(x_ref, w_ref, g_ref, b_ref, o_ref):
    k = pl.program_id(0)

    @pl.when(k == 0)
    def _():
        o_ref[...] = jnp.zeros_like(o_ref)

    o_ref[...] += jnp.dot(x_ref[...].astype(jnp.bfloat16), w_ref[...],
                          preferred_element_type=jnp.float32)

    @pl.when(k == pl.num_programs(0) - 1)
    def _():
        o_ref[...] = _layernorm_silu(o_ref[...], g_ref[...], b_ref[...])


def lin0_ln_silu(x, w_bf16, gamma_2d, beta_2d, *, tk, vmem_limit):
    """x: (B, K) f32; w_bf16: (K_pad, H) bf16 already zero-padded offline so
    that K_pad % tk == 0; gamma_2d/beta_2d: (1, H) f32 (pre-reshaped)."""
    B, K = x.shape
    K_pad, H = w_bf16.shape
    tk = min(tk, K_pad)
    assert K_pad % tk == 0, (K_pad, tk)
    if K_pad != K:
        # Only the tiny activation is padded per call; padded weight rows are
        # zero so the extra K contributes nothing to the dot.
        x = jnp.pad(x, ((0, 0), (0, K_pad - K)))
    nk = K_pad // tk
    return pl.pallas_call(
        _lin0_kernel,
        out_shape=jax.ShapeDtypeStruct((B, H), jnp.float32),
        grid=(nk,),
        in_specs=[
            pl.BlockSpec((B, tk), lambda k: (0, k)),
            pl.BlockSpec((tk, H), lambda k: (k, 0)),
            pl.BlockSpec((1, H), lambda k: (0, 0)),
            pl.BlockSpec((1, H), lambda k: (0, 0)),
        ],
        out_specs=pl.BlockSpec((B, H), lambda k: (0, 0)),
        compiler_params=pltpu.CompilerParams(
            dimension_semantics=("arbitrary",),
            vmem_limit_bytes=vmem_limit),
    )(x, w_bf16, gamma_2d, beta_2d)


# ----------------------------------------------------------------------------
# Kernel 2: the whole residual MLP stack in ONE pallas_call.
#   grid = (n_blocks, K_tiles).  Stacked (L, H, H) bf16 weights stream one
#   (tk, H) tile per step (squeezed leading dim); the activation/residual
#   (B, H) stays resident in a VMEM scratch across all layers; per-layer
#   epilogue does LN+SiLU+residual add; the output block is written only
#   after the final layer.
# ----------------------------------------------------------------------------
def _mlp_stack_kernel(x_in_ref, w_ref, g_ref, b_ref, o_ref, x_sc):
    l = pl.program_id(0)
    k = pl.program_id(1)
    nk = pl.num_programs(1)
    tk = w_ref.shape[0]            # squeezed leading dim: w_ref is (tk, H)

    @pl.when(jnp.logical_and(l == 0, k == 0))
    def _():
        x_sc[...] = x_in_ref[...]          # load initial activation into residence

    @pl.when(k == 0)
    def _():
        o_ref[...] = jnp.zeros_like(o_ref)  # reset the f32 accumulator per layer

    start = pl.multiple_of(k * tk, tk)
    xk = x_sc[:, pl.ds(start, tk)].astype(jnp.bfloat16)
    o_ref[...] += jnp.dot(xk, w_ref[...], preferred_element_type=jnp.float32)

    last_k = k == nk - 1

    @pl.when(last_k)
    def _():
        y = _layernorm_silu(o_ref[...], g_ref[...], b_ref[...])
        x_sc[...] = y + x_sc[...]           # x = block(x) + residual; residual = x

    @pl.when(jnp.logical_and(last_k, l == pl.num_programs(0) - 1))
    def _():
        o_ref[...] = x_sc[...]              # only the final layer's copy is live


def mlp_residual_stack(x, w_stack_bf16, g_stack_3d, b_stack_3d, *, tk, vmem_limit):
    """x: (B, H) f32, w_stack: (L, H, H) bf16, g/b_stack: (L, 1, H) f32."""
    B, H = x.shape
    L = w_stack_bf16.shape[0]
    if L == 0:
        return x
    tk = min(tk, H)
    assert H % tk == 0, (H, tk)
    nk = H // tk
    return pl.pallas_call(
        _mlp_stack_kernel,
        out_shape=jax.ShapeDtypeStruct((B, H), jnp.float32),
        grid=(L, nk),
        in_specs=[
            pl.BlockSpec((B, H), lambda l, k: (0, 0)),
            pl.BlockSpec((None, tk, H), lambda l, k: (l, k, 0)),   # -> (tk, H)
            pl.BlockSpec((None, 1, H), lambda l, k: (l, 0, 0)),    # -> (1, H)
            pl.BlockSpec((None, 1, H), lambda l, k: (l, 0, 0)),    # -> (1, H)
        ],
        out_specs=pl.BlockSpec((B, H), lambda l, k: (0, 0)),
        scratch_shapes=[pltpu.VMEM((B, H), jnp.float32)],
        compiler_params=pltpu.CompilerParams(
            dimension_semantics=("arbitrary", "arbitrary"),
            vmem_limit_bytes=vmem_limit),
    )(x, w_stack_bf16, g_stack_3d, b_stack_3d)


# ----------------------------------------------------------------------------
# Kernel 3: lin1 (h -> C*side*side, no bias) with GroupNorm(1, C) fused in the
#           epilogue.  Full (B, N) output resident in VMEM, K-tiled weight
#           streaming.  GN gamma/beta arrive pre-expanded per-element (offline)
#           so the epilogue is a lane-dense row-normalize + affine.
# ----------------------------------------------------------------------------
def _lin1_gn_kernel(x_ref, w_ref, g_ref, b_ref, o_ref):
    k = pl.program_id(0)

    @pl.when(k == 0)
    def _():
        o_ref[...] = jnp.zeros_like(o_ref)

    o_ref[...] += jnp.dot(x_ref[...].astype(jnp.bfloat16), w_ref[...],
                          preferred_element_type=jnp.float32)

    @pl.when(k == pl.num_programs(0) - 1)
    def _():
        y = o_ref[...]
        mu = jnp.mean(y, axis=-1, keepdims=True)          # 1 group => stats over C*H*W
        var = jnp.mean((y - mu) ** 2, axis=-1, keepdims=True)
        y = (y - mu) * jax.lax.rsqrt(var + GN_EPS)
        o_ref[...] = y * g_ref[...] + b_ref[...]


def lin1_groupnorm(x, w_bf16, gn_g_row, gn_b_row, *, side, tk, vmem_limit):
    """x: (B, H) f32; w_bf16: (H, N) bf16 with N = C*side*side;
    gn_g_row/gn_b_row: (1, N) f32 (pre-expanded offline).  Returns (B, C, side, side)."""
    B, H = x.shape
    N = w_bf16.shape[1]
    C = N // (side * side)
    tk = min(tk, H)
    assert H % tk == 0, (H, tk)
    nk = H // tk
    out = pl.pallas_call(
        _lin1_gn_kernel,
        out_shape=jax.ShapeDtypeStruct((B, N), jnp.float32),
        grid=(nk,),
        in_specs=[
            pl.BlockSpec((B, tk), lambda k: (0, k)),
            pl.BlockSpec((tk, N), lambda k: (k, 0)),
            pl.BlockSpec((1, N), lambda k: (0, 0)),
            pl.BlockSpec((1, N), lambda k: (0, 0)),
        ],
        out_specs=pl.BlockSpec((B, N), lambda k: (0, 0)),
        compiler_params=pltpu.CompilerParams(
            dimension_semantics=("arbitrary",),
            vmem_limit_bytes=vmem_limit),
    )(x, w_bf16, gn_g_row, gn_b_row)
    return out.reshape(B, C, side, side)


# ----------------------------------------------------------------------------
# Forward pass (mirrors Voxel2StableDiffusionModel.forward, ups_mode='4x')
# ----------------------------------------------------------------------------
def voxel2sd_forward(x, prepared, *, side=16,
                     tk_lin0=None, tk_mlp=None, tk_lin1=None, vmem_limit=None):
    if None in (tk_lin0, tk_mlp, tk_lin1, vmem_limit):
        t = _select_tuning()
        tk_lin0 = t["tk_lin0"] if tk_lin0 is None else tk_lin0
        tk_mlp = t["tk_mlp"] if tk_mlp is None else tk_mlp
        tk_lin1 = t["tk_lin1"] if tk_lin1 is None else tk_lin1
        vmem_limit = t["vmem_limit"] if vmem_limit is None else vmem_limit

    # lin0 = Linear -> LayerNorm -> SiLU -> Dropout(0.5)  (dropout == identity in eval)
    x = lin0_ln_silu(x, prepared["w0"], prepared["g0"], prepared["b0"],
                     tk=tk_lin0, vmem_limit=vmem_limit)
    # mlp: 4 x [Linear -> LayerNorm -> SiLU -> Dropout(0.25)] with residual adds, fused
    x = mlp_residual_stack(x, prepared["w_mlp"], prepared["g_mlp"], prepared["b_mlp"],
                           tk=tk_mlp, vmem_limit=vmem_limit)
    # lin1 (h -> C*side*side) + reshape (B, C, side, side) + GroupNorm(1, C), fused
    x = lin1_groupnorm(x, prepared["w1"], prepared["gn_g"], prepared["gn_b"],
                       side=side, tk=tk_lin1, vmem_limit=vmem_limit)
    # TODO(synk): self.upsampler is diffusers' Decoder (external class, not defined in
    # src/models.py); returning the normalized latent it would consume.
    return x


# ----------------------------------------------------------------------------
# Parameters.
#   make_raw_params: f32 "checkpoint" params (logical module weights, Linear
#     weights already stored as (in, out)).
#   prepare_params: ONE-TIME device-friendly prep (bf16 cast, zero-pad w0's K
#     dim to a tile multiple, reshape LN params, expand GN params).  This is
#     deliberately OUT of the per-forward hot path.
# ----------------------------------------------------------------------------
def make_raw_params(key, in_dim, h, n_blocks, n_out=16384, n_ch=64):
    ks = jax.random.split(key, 8)
    p = {}
    p["w0"] = jax.random.normal(ks[0], (in_dim, h), jnp.float32) / jnp.sqrt(in_dim)
    p["g0"] = 1.0 + 0.1 * jax.random.normal(ks[1], (h,), jnp.float32)
    p["b0"] = 0.1 * jax.random.normal(ks[2], (h,), jnp.float32)
    p["w_mlp"] = jax.random.normal(ks[3], (n_blocks, h, h), jnp.float32) / jnp.sqrt(h)
    p["g_mlp"] = 1.0 + 0.1 * jax.random.normal(ks[4], (n_blocks, h), jnp.float32)
    p["b_mlp"] = 0.1 * jax.random.normal(ks[5], (n_blocks, h), jnp.float32)
    p["w1"] = jax.random.normal(ks[6], (h, n_out), jnp.float32) / jnp.sqrt(h)
    kg, kb = jax.random.split(ks[7])
    p["gn_g"] = 1.0 + 0.1 * jax.random.normal(kg, (n_ch,), jnp.float32)
    p["gn_b"] = 0.1 * jax.random.normal(kb, (n_ch,), jnp.float32)
    return p


def prepare_params(raw, *, tk_lin0, side=16):
    in_dim, h = raw["w0"].shape
    L = raw["w_mlp"].shape[0]
    k_pad = -(-in_dim // tk_lin0) * tk_lin0
    w0 = raw["w0"].astype(jnp.bfloat16)
    if k_pad != in_dim:
        w0 = jnp.pad(w0, ((0, k_pad - in_dim), (0, 0)))   # zero tail rows: no contribution
    return {
        "w0": w0,
        "g0": raw["g0"].reshape(1, h).astype(jnp.float32),
        "b0": raw["b0"].reshape(1, h).astype(jnp.float32),
        "w_mlp": raw["w_mlp"].astype(jnp.bfloat16),
        "g_mlp": raw["g_mlp"].reshape(L, 1, h).astype(jnp.float32),
        "b_mlp": raw["b_mlp"].reshape(L, 1, h).astype(jnp.float32),
        "w1": raw["w1"].astype(jnp.bfloat16),
        "gn_g": jnp.repeat(raw["gn_g"].astype(jnp.float32), side * side).reshape(1, -1),
        "gn_b": jnp.repeat(raw["gn_b"].astype(jnp.float32), side * side).reshape(1, -1),
    }


# ----------------------------------------------------------------------------
# Pure-JAX reference mirroring the kernel numerics (bf16 matmul operands,
# f32 accumulation & norms) so the tolerance can be tight.
# ----------------------------------------------------------------------------
def _ref_forward(x, raw, *, side=16):
    def mm(a, w):
        return jnp.dot(a.astype(jnp.bfloat16).astype(jnp.float32),
                       w.astype(jnp.bfloat16).astype(jnp.float32),
                       precision=jax.lax.Precision.HIGHEST)

    def lls(a, w, g, b):
        y = mm(a, w)
        mu = y.mean(-1, keepdims=True)
        var = ((y - mu) ** 2).mean(-1, keepdims=True)
        y = (y - mu) / jnp.sqrt(var + LN_EPS) * g + b
        return y * jax.nn.sigmoid(y)

    x = lls(x, raw["w0"], raw["g0"], raw["b0"])
    r = x
    for i in range(raw["w_mlp"].shape[0]):
        x = lls(x, raw["w_mlp"][i], raw["g_mlp"][i], raw["b_mlp"][i]) + r
        r = x
    y = mm(x, raw["w1"])
    B = y.shape[0]
    C = y.shape[1] // (side * side)
    mu = y.mean(-1, keepdims=True)
    var = ((y - mu) ** 2).mean(-1, keepdims=True)
    yn = ((y - mu) / jnp.sqrt(var + GN_EPS)).reshape(B, C, side, side)
    return yn * raw["gn_g"][None, :, None, None] + raw["gn_b"][None, :, None, None]


if __name__ == "__main__":
    B = 2
    in_dim = 500      # scaled-down voxel dim (real: 15724) — NOT a multiple of the
                      # tile size, to exercise the offline K-padding path
    h = 256           # scaled-down hidden (real: 4096)
    n_blocks = 4
    side = 16
    n_ch = 64
    n_out = n_ch * side * side   # 16384, same as the real '4x' model

    key = jax.random.PRNGKey(0)
    kx, kp = jax.random.split(key)
    x = jax.random.normal(kx, (B, in_dim), jnp.float32)

    raw = make_raw_params(kp, in_dim, h, n_blocks, n_out=n_out, n_ch=n_ch)

    # Small tile sizes so the K-accumulation / multi-layer pipelines are exercised
    # at toy shapes (per-generation defaults from _select_tuning are sized for
    # the real model: in_dim=15724, h=4096).
    tk_lin0 = tk_mlp = tk_lin1 = 128
    prepared = jax.tree_util.tree_map(
        jax.block_until_ready, prepare_params(raw, tk_lin0=tk_lin0, side=side))

    out = voxel2sd_forward(x, prepared, side=side,
                           tk_lin0=tk_lin0, tk_mlp=tk_mlp, tk_lin1=tk_lin1)
    out = jax.block_until_ready(out)

    assert out.shape == (B, n_ch, side, side), out.shape
    assert out.dtype == jnp.float32

    ref = jax.block_until_ready(_ref_forward(x, raw, side=side))
    max_err = float(jnp.max(jnp.abs(out - ref)))
    assert max_err < 5e-3, f"mismatch vs reference: {max_err}"

    print("KERNEL_OK")
</pallas_src>

<mosaic_0001>
module attributes {stable_mosaic.version = 11 : i64} {
  func.func @_lin0_kernel(%arg0: i32, %arg1: memref<2x128xf32, #tpu.memory_space<vmem>>, %arg2: memref<128x256xbf16, #tpu.memory_space<vmem>>, %arg3: memref<1x256xf32, #tpu.memory_space<vmem>>, %arg4: memref<1x256xf32, #tpu.memory_space<vmem>>, %arg5: memref<2x256xf32, #tpu.memory_space<vmem>>) attributes {dimension_semantics = [#tpu.dimension_semantics<arbitrary>], iteration_bounds = array<i64: 4>, scalar_prefetch = 0 : i64, scratch_operands = 0 : i64, tpu.core_type = #tpu.core_type<tc>, window_params = [{transform_indices = @transform_0, window_bounds = array<i64: 2, 128>}, {transform_indices = @transform_1, window_bounds = array<i64: 128, 256>}, {pipeline_mode = #tpu.pipeline_mode<synchronous>, transform_indices = @transform_2, window_bounds = array<i64: 1, 256>}, {pipeline_mode = #tpu.pipeline_mode<synchronous>, transform_indices = @transform_3, window_bounds = array<i64: 1, 256>}, {pipeline_mode = #tpu.pipeline_mode<synchronous>, transform_indices = @transform_4, window_bounds = array<i64: 2, 256>}]} {
    %c0_i32 = arith.constant 0 : i32
    %0 = arith.cmpi eq, %arg0, %c0_i32 : i32
    %1 = arith.extui %0 : i1 to i32
    %c0_i32_0 = arith.constant 0 : i32
    %2 = arith.cmpi ne, %1, %c0_i32_0 : i32
    scf.if %2 {
      %cst_9 = arith.constant 0.000000e+00 : f32
      %13 = vector.broadcast %cst_9 : f32 to vector<2x256xf32>
      %c0_10 = arith.constant 0 : index
      %c0_11 = arith.constant 0 : index
      %14 = vector.load %arg5[%c0_10, %c0_11] : memref<2x256xf32, #tpu.memory_space<vmem>>, vector<2x256xf32>
      tpu.vector_store %arg5[%c0_10, %c0_11], %13 {strides = array<i32>} : memref<2x256xf32, #tpu.memory_space<vmem>>, vector<2x256xf32>,
    } else {
    }
    %c0 = arith.constant 0 : index
    %c0_1 = arith.constant 0 : index
    %3 = vector.load %arg5[%c0, %c0_1] : memref<2x256xf32, #tpu.memory_space<vmem>>, vector<2x256xf32>
    %c0_2 = arith.constant 0 : index
    %c0_3 = arith.constant 0 : index
    %4 = vector.load %arg1[%c0_2, %c0_3] : memref<2x128xf32, #tpu.memory_space<vmem>>, vector<2x128xf32>
    %5 = arith.truncf %4 : vector<2x128xf32> to vector<2x128xbf16>
    %c0_4 = arith.constant 0 : index
    %c0_5 = arith.constant 0 : index
    %6 = vector.load %arg2[%c0_4, %c0_5] : memref<128x256xbf16, #tpu.memory_space<vmem>>, vector<128x256xbf16>
    %cst = arith.constant dense<0.000000e+00> : vector<2x256xf32>
    %7 = tpu.matmul %5, %6, %cst {dimension_numbers = #tpu.dot_dimension_numbers<[1], [0], [0], [1], [0, 0, 1, 1], [], []>} : vector<2x128xbf16>, vector<128x256xbf16>, vector<2x256xf32> -> vector<2x256xf32>
    %8 = arith.addf %3, %7 : vector<2x256xf32>
    %c0_6 = arith.constant 0 : index
    %c0_7 = arith.constant 0 : index
    %9 = vector.load %arg5[%c0_6, %c0_7] : memref<2x256xf32, #tpu.memory_space<vmem>>, vector<2x256xf32>
    tpu.vector_store %arg5[%c0_6, %c0_7], %8 {strides = array<i32>} : memref<2x256xf32, #tpu.memory_space<vmem>>, vector<2x256xf32>,
    %c3_i32 = arith.constant 3 : i32
    %10 = arith.cmpi eq, %arg0, %c3_i32 : i32
    %11 = arith.extui %10 : i1 to i32
    %c0_i32_8 = arith.constant 0 : i32
    %12 = arith.cmpi ne, %11, %c0_i32_8 : i32
    scf.if %12 {
      %c0_9 = arith.constant 0 : index
      %c0_10 = arith.constant 0 : index
      %13 = vector.load %arg5[%c0_9, %c0_10] : memref<2x256xf32, #tpu.memory_space<vmem>>, vector<2x256xf32>
      %c0_11 = arith.constant 0 : index
      %c0_12 = arith.constant 0 : index
      %14 = vector.load %arg3[%c0_11, %c0_12] : memref<1x256xf32, #tpu.memory_space<vmem>>, vector<1x256xf32>
      %c0_13 = arith.constant 0 : index
      %c0_14 = arith.constant 0 : index
      %15 = vector.load %arg4[%c0_13, %c0_14] : memref<1x256xf32, #tpu.memory_space<vmem>>, vector<1x256xf32>
      %cst_15 = arith.constant dense<0.000000e+00> : vector<2xf32>
      %16 = vector.multi_reduction <add>, %13, %cst_15 [1] : vector<2x256xf32> to vector<2xf32>
      %17 = vector.shape_cast %16 : vector<2xf32> to vector<2x1xf32>
      %cst_16 = arith.constant 2.560000e+02 : f32
      %18 = vector.broadcast %cst_16 : f32 to vector<2x1xf32>
      %19 = arith.divf %17, %18 : vector<2x1xf32>
      %20 = vector.broadcast %19 : vector<2x1xf32> to vector<2x256xf32>
      %21 = arith.subf %13, %20 : vector<2x256xf32>
      %22 = arith.mulf %21, %21 : vector<2x256xf32>
      %cst_17 = arith.constant dense<0.000000e+00> : vector<2xf32>
      %23 = vector.multi_reduction <add>, %22, %cst_17 [1] : vector<2x256xf32> to vector<2xf32>
      %24 = vector.shape_cast %23 : vector<2xf32> to vector<2x1xf32>
      %cst_18 = arith.constant 2.560000e+02 : f32
      %25 = vector.broadcast %cst_18 : f32 to vector<2x1xf32>
      %26 = arith.divf %24, %25 : vector<2x1xf32>
      %27 = vector.broadcast %19 : vector<2x1xf32> to vector<2x256xf32>
      %28 = arith.subf %13, %27 : vector<2x256xf32>
      %cst_19 = arith.constant 9.99999974E-6 : f32
      %29 = vector.broadcast %cst_19 : f32 to vector<2x1xf32>
      %30 = arith.addf %26, %29 : vector<2x1xf32>
      %31 = math.rsqrt %30 : vector<2x1xf32>
      %32 = vector.broadcast %31 : vector<2x1xf32> to vector<2x256xf32>
      %33 = arith.mulf %28, %32 : vector<2x256xf32>
      %34 = vector.broadcast %14 : vector<1x256xf32> to vector<2x256xf32>
      %35 = arith.mulf %33, %34 : vector<2x256xf32>
      %36 = vector.broadcast %15 : vector<1x256xf32> to vector<2x256xf32>
      %37 = arith.addf %35, %36 : vector<2x256xf32>
      %38 = arith.negf %37 : vector<2x256xf32>
      %39 = math.exp %38 : vector<2x256xf32>
      %cst_20 = arith.constant 1.000000e+00 : f32
      %40 = vector.broadcast %cst_20 : f32 to vector<2x256xf32>
      %41 = arith.addf %40, %39 : vector<2x256xf32>
      %42 = arith.divf %40, %41 : vector<2x256xf32>
      %43 = arith.mulf %37, %42 : vector<2x256xf32>
      %c0_21 = arith.constant 0 : index
      %c0_22 = arith.constant 0 : index
      %44 = vector.load %arg5[%c0_21, %c0_22] : memref<2x256xf32, #tpu.memory_space<vmem>>, vector<2x256xf32>
      tpu.vector_store %arg5[%c0_21, %c0_22], %43 {strides = array<i32>} : memref<2x256xf32, #tpu.memory_space<vmem>>, vector<2x256xf32>,
    } else {
    }
    return
  }
  func.func @transform_0(%arg0: i32) -> (i32, i32) {
    %c0_i32 = arith.constant 0 : i32
    %c0_i32_0 = arith.constant 0 : i32
    return %c0_i32, %arg0 : i32, i32
  }
  func.func @transform_1(%arg0: i32) -> (i32, i32) {
    %c0_i32 = arith.constant 0 : i32
    %c0_i32_0 = arith.constant 0 : i32
    return %arg0, %c0_i32 : i32, i32
  }
  func.func @transform_2(%arg0: i32) -> (i32, i32) {
    %c0_i32 = arith.constant 0 : i32
    %c0_i32_0 = arith.constant 0 : i32
    %c0_i32_1 = arith.constant 0 : i32
    return %c0_i32, %c0_i32_0 : i32, i32
  }
  func.func @transform_3(%arg0: i32) -> (i32, i32) {
    %c0_i32 = arith.constant 0 : i32
    %c0_i32_0 = arith.constant 0 : i32
    %c0_i32_1 = arith.constant 0 : i32
    return %c0_i32, %c0_i32_0 : i32, i32
  }
  func.func @transform_4(%arg0: i32) -> (i32, i32) {
    %c0_i32 = arith.constant 0 : i32
    %c0_i32_0 = arith.constant 0 : i32
    %c0_i32_1 = arith.constant 0 : i32
    return %c0_i32, %c0_i32_0 : i32, i32
  }
}

</mosaic_0001>

<bundles_post_ra>
// kernel: tpu_custom_call.1
= control target key start
LH: loop header
LB: loop body
LE: loop exit
PB: predicated region body
PF: predicated region fallthrough
CT: control target
= control target key end

     0   :  { %9 = vsyncpa [#allocation3], 0  ;;  %s1142_s0 = inlined_call_operand.hbm [shape: f32[2,512], index: 0, kind: input, shape index: {}]   ;;  %s1143_s1 = inlined_call_operand.hbm [shape: bf16[512,256], index: 1, kind: input, shape index: {}]   ;;  %s1144_s2 = inlined_call_operand.hbm [shape: f32[1,256], index: 2, kind: input, shape index: {}]   ;;  %s1145_s3 = inlined_call_operand.vmem [shape: f32[1,256], index: 3, kind: input, shape index: {}]   ;;  %s1146_s4 = inlined_call_operand.hbm [shape: f32[2,256], index: 4, kind: output, shape index: {}]  }
   0x1   :  { %11 = vsyncpa [#allocation3 + $0x1], 0 }
   0x2   :  { %12 = vsyncpa [#allocation6], 0 }
   0x3   :  { %14 = vsyncpa [#allocation6 + $0x1], 0 }
   0x4   :  { %15 = vsyncpa [#allocation4], 0  ;;  %s965_s15 = smov 0   ;;  %s967_s16 = smov 0  }
   0x5   :  { %s969_s17 = smov 0   ;;  %s971_s18 = smov 0  }
   0x6 LB: > { %s984_s19 = sadd.s32 4294967295, %s931_s18   ;;  %p41_p0 = scmp.ne.s32.totalorder %s923_s16, %s919_s15  ;;  %s931_s18 = sphi %s971_s18, %s1153_s18   ;;  %s927_s17 = sphi %s969_s17, %s1152_s17   ;;  %s923_s16 = sphi %s967_s16, %s1151_s16   ;;  %s919_s15 = sphi %s965_s15, %s1150_s15  }
   0x7   : > { %p42_p1 = scmp.eq.s32.totalorder %s984_s19, 0  ;;  %p590_p2 = scmp.ge.s32.totalorder %s931_s18, 1 }
   0x8   : > { %p141_p3 = scmp.lt.s32.totalorder %s931_s18, 5  ;;  %p591_p4 = scmp.ne.s32.totalorder %s984_s19, 0 }
   0x9   : > { %p993_p5 = por %p42_p1, %p41_p0  ;;  %s153_s23 = sshll.u32 %s1144_s2, 4  ;;  %s154_s23 = int_to_ptr.hbm [resolvable:$true] %s153_s23 }
   0xa   : > { %p1000_p6 = pnand %p590_p2, %p141_p3  ;;  %s933_s25 = smov [#allocation7]  }
   0xb   : > { %s155_s26 = sshll.u32 %s933_s25, 4  ;;  %s1009_s27 = sadd.s32 1, %s931_s18   ;;  %s156_s26 = int_to_ptr.vmem [resolvable:$true] %s155_s26 }
   0xc   : > { %p704_p7 = pneg %p1000_p6  ;;  %s28_s28 = sadd.s32 1, %s927_s17 }
   0xd   : > { %s25_s29 = ssub.s32 %s931_s18, %s1009_s27  ;;  %p35_p10 = scmp.ne.s32.totalorder %s927_s17, %s923_s16 }
   0xe   : > { %p705_p8 = pnand %p704_p7, %p42_p1  ;;  %p26_p9 = scmp.eq.s32.totalorder %s25_s29, 0 }
   0xf   : > { %p36_p11 = scmp.eq.s32.totalorder %s931_s18, 0  ;;  %p716_p12 = scmp.lt.s32.totalorder %s931_s18, 4 }
  0x10   : > { %707 = dma.hbm_to_vmem [thread:$0]  (!%p705_p8), %s154_s23, 32, %s156_s26, [#allocation6]  }
  0x11   : > { %s1019_s30 = scalar_select %p26_p9, %s927_s17, %s28_s28  }
  0x12   : > { %p37_p13 = por %p36_p11, %p35_p10  ;;  %s169_s5 = sand.u32 1, %s927_s17  }
  0x13   : > { %s593_s6 = sshll.u32 %s169_s5, 1  ;;  %s594_s7 = sshll.u32 %s931_s18, 1 }
  0x14   : > { %s177_s10 = scalar_lea.hbm %s1142_s0, %s594_s7  ;;  %s173_s11 = scalar_lea.vmem [#allocation2], %s593_s6 }
  0x15   : > { %s181_s12 = sshll.u32 %s173_s11, 4  ;;  %s179_s13 = sshll.u32 %s177_s10, 4  ;;  %s182_s12 = int_to_ptr.vmem [resolvable:$true] %s181_s12  ;;  %s180_s13 = int_to_ptr.hbm [resolvable:$true] %s179_s13 }
  0x16   : > { %p1026_p0 = pnand %p716_p12, %p37_p13  ;;  %s595_s15 = sshll.u32 %s169_s5, 7 }
  0x17   : > { %s188_s21 = sand.u32 1, %s931_s18   ;;  %s170_s22 = scalar_lea.sflag [#allocation3], %s169_s5 }
  0x18   : > { %s797_s23 = sshra.s32 %s180_s13, 4  ;;  %p801_p3 = pneg %p1026_p0  ;;  %s798_s23 = int_to_ptr.hbm [resolvable:$true] %s797_s23 }
  0x19   : > { %s799_s25 = scalar_lea.hbm %s798_s23, 2  ;;  %s804_s29 = scalar_lea.hbm %s1142_s0, 8 }
  0x1a   : > { %p800_p2 = scmp.ne.s32.totalorder %s798_s23, %s799_s25  ;;  %p805_p9 = scmp.lt.s32.totalorder %s798_s23, %s1142_s0 }
  0x1b   : > { %p806_p10 = scmp.lt.s32.totalorder %s804_s29, %s799_s25 }
  0x1c   : > { %p802_p7 = pnand %p801_p3, %p800_p2 }
  0x1d   : > { %p807_p11 = por %p806_p10, %p805_p9 }
  0x1e   : > { %p803_p8 = pneg %p802_p7 }
  0x20   : > { %p808_p12 = pnand %p807_p11, %p803_p8 }
  0x22   : > { %811 = shalt.err (!%p808_p12)
}
  0x23   : > { %711 = dma.hbm_to_vmem [thread:$0]  (!%p1026_p0), %s180_s13, 32, %s182_s12, %s170_s22  }
  0x24   : > { %s192_s5 = scalar_lea.vmem [#allocation5], %s595_s15  ;;  %s675_s9 = sshll.u32 %s931_s18, 7 }
  0x25   : > { %s201_s8 = sshll.u32 %s192_s5, 4  ;;  %s198_s26 = scalar_lea.hbm %s1143_s1, %s675_s9  ;;  %s202_s8 = int_to_ptr.vmem [resolvable:$true] %s201_s8 }
  0x26   : > { %s199_s28 = sshll.u32 %s198_s26, 4  ;;  %s189_s23 = scalar_lea.sflag [#allocation6], %s188_s21  ;;  %s200_s28 = int_to_ptr.hbm [resolvable:$true] %s199_s28 }
  0x27   : > { %s827_s25 = sshra.s32 %s200_s28, 4  ;;  %s834_s15 = scalar_lea.hbm %s1143_s1, 512  ;;  %s828_s25 = int_to_ptr.hbm [resolvable:$true] %s827_s25 }
  0x28   : > { %s829_s29 = scalar_lea.hbm %s828_s25, 128  ;;  %p835_p8 = scmp.lt.s32.totalorder %s828_s25, %s1143_s1 }
  0x29   : > { %p830_p13 = scmp.ne.s32.totalorder %s828_s25, %s829_s29  ;;  %p836_p9 = scmp.lt.s32.totalorder %s834_s15, %s829_s29 }
  0x2b   : > { %p832_p2 = pnand %p830_p13, %p801_p3  ;;  %p837_p10 = por %p836_p9, %p835_p8 }
  0x2d   : > { %p833_p7 = pneg %p832_p2 }
  0x2f   : > { %p838_p11 = pnand %p837_p10, %p833_p7 }
  0x31   : > { %841 = shalt.err (!%p838_p11)
}
  0x32   : > { %s934_s21 = smov 128   ;;  %s935_s6 = smov 8  }
  0x33   : > { %714 = dma.hbm_to_vmem [thread:$0]  (!%p1026_p0), %s200_s28, 2048, %s202_s8, %s189_s23, %s934_s21, %s934_s21, %s935_s6  }
  0x34   : > { %213 = sbr.rel (%p1000_p6) target bundleno = 572 (0x23c), region = 36  ;;  %s215_s7 = sand.u32 (!%p1000_p6), 1, %s923_s16  }
  0x35   : > { %s600_s5 = sshll.u32 (!%p1000_p6), %s215_s7, 1  ;;  %s216_s9 = scalar_lea.sflag (!%p1000_p6), [#allocation3], %s215_s7 }
  0x36   : > { %s1062_s10 = scalar_lea.vmem (!%p1000_p6), [#allocation2], %s600_s5 }
  0x39   : > { %902 = dma.done.wait (%p993_p5), %s216_s9, 32  }
  0x3a   : > { %904 = vsyncadd (%p993_p5), %s216_s9, 4294967264  ;;  %s225_s11 = sand.u32 1, %s984_s19   ;;  %s601_s14 = sshll.u32 %s215_s7, 7 }
  0x3b   : > { %s226_s8 = scalar_lea.sflag [#allocation6], %s225_s11  ;;  %s1069_s26 = scalar_lea.vmem [#allocation5], %s601_s14 }
  0x3c   : > { %906 = dma.done.wait (%p993_p5), %s226_s8, 2048  }
  0x3d   : > { %908 = vsyncadd (%p993_p5), %s226_s8, 4294965248 }
  0x3e   : > { %910 = dma.done.wait (%p42_p1), [#allocation6], 32  }
  0x3f   : > { %912 = vsyncadd (%p42_p1), [#allocation6], 4294967264  ;;  %264 = sbr.rel (%p591_p4) target bundleno = 70 (0x46), region = 52 }
  0x44   : > { %v936_v0 = vmov 0.0  }
  0x45   : > { %265 = vst [vmem:[#allocation8] sm:$0xf] %v936_v0 }
  0x46 PF: > { %v662_v1 = vld [vmem:[%s1069_s26 + $0x70] sm:$0xf]  ;;  %v691_v2 = vld [vmem:[%s1069_s26 + $0x74] sm:$0xf0]  ;;  %v690_v3 = vld [vmem:[%s1069_s26 + $0x74] sm:$0xf] }
  0x47   : > { %v663_v4 = vor.u32 %v691_v2, %v662_v1  ;;  %v664_v5 = vld [vmem:[%s1069_s26 + $0x78] sm:$0xf0]  ;;  %v654_v6 = vld [vmem:[%s1069_s26 + $0x60] sm:$0xf]  ;;  %v689_v7 = vld [vmem:[%s1069_s26 + $0x64] sm:$0xf0] }
  0x48   : > { %v667_v8 = vor.u32 %v690_v3, %v664_v5  ;;  %v688_v9 = vld [vmem:[%s1069_s26 + $0x64] sm:$0xf]  ;;  %v656_v10 = vld [vmem:[%s1069_s26 + $0x68] sm:$0xf0]  ;;  %v655_v11 = vor.u32 %v689_v7, %v654_v6  ;;  %v646_v13 = vld [vmem:[%s1069_s26 + $0x50] sm:$0xf] }
  0x49   : > { %365 = vmatpush.bf16.msra.mxu0 %v663_v4  ;;  %v659_v12 = vor.u32 %v688_v9, %v656_v10  ;;  %v687_v14 = vld [vmem:[%s1069_s26 + $0x54] sm:$0xf0]  ;;  %v686_v15 = vld [vmem:[%s1069_s26 + $0x54] sm:$0xf]  ;;  %v648_v16 = vld [vmem:[%s1069_s26 + $0x58] sm:$0xf0] }
  0x4a   : > { %378 = vmatpush.bf16.msra.mxu1 %v667_v8  ;;  %v647_v17 = vor.u32 %v687_v14, %v646_v13  ;;  %v651_v18 = vor.u32 %v686_v15, %v648_v16  ;;  %v638_v19 = vld [vmem:[%s1069_s26 + $0x40] sm:$0xf]  ;;  %v685_v20 = vld [vmem:[%s1069_s26 + $0x44] sm:$0xf0]  ;;  %v684_v21 = vld [vmem:[%s1069_s26 + $0x44] sm:$0xf] }
  0x4b   : > { %v640_v22 = vld [vmem:[%s1069_s26 + $0x48] sm:$0xf0]  ;;  %v639_v23 = vor.u32 %v685_v20, %v638_v19  ;;  %v630_v25 = vld [vmem:[%s1069_s26 + $0x30] sm:$0xf]  ;;  %v683_v26 = vld [vmem:[%s1069_s26 + $0x34] sm:$0xf0] }
  0x4c   : > { %v643_v24 = vor.u32 %v684_v21, %v640_v22  ;;  %v682_v27 = vld [vmem:[%s1069_s26 + $0x34] sm:$0xf]  ;;  %v632_v28 = vld [vmem:[%s1069_s26 + $0x38] sm:$0xf0]  ;;  %v631_v29 = vor.u32 %v683_v26, %v630_v25  ;;  %v622_v31 = vld [vmem:[%s1069_s26 + $0x20] sm:$0xf] }
  0x4d   : > { %366 = vmatpush.bf16.msra.mxu0 %v655_v11  ;;  %v635_v30 = vor.u32 %v682_v27, %v632_v28  ;;  %v681_v32 = vld [vmem:[%s1069_s26 + $0x24] sm:$0xf0]  ;;  %v680_v33 = vld [vmem:[%s1069_s26 + $0x24] sm:$0xf]  ;;  %v624_v34 = vld [vmem:[%s1069_s26 + $0x28] sm:$0xf0] }
  0x4e   : > { %379 = vmatpush.bf16.msra.mxu1 %v659_v12  ;;  %v623_v35 = vor.u32 %v681_v32, %v622_v31  ;;  %v627_v36 = vor.u32 %v680_v33, %v624_v34  ;;  %v614_v37 = vld [vmem:[%s1069_s26 + $0x10] sm:$0xf]  ;;  %v679_v38 = vld [vmem:[%s1069_s26 + $0x14] sm:$0xf0]  ;;  %v678_v39 = vld [vmem:[%s1069_s26 + $0x14] sm:$0xf] }
  0x4f   : > { %v616_v40 = vld [vmem:[%s1069_s26 + $0x18] sm:$0xf0]  ;;  %v615_v41 = vor.u32 %v679_v38, %v614_v37  ;;  %v606_v43 = vld [vmem:[%s1069_s26] sm:$0xf]  ;;  %v677_v44 = vld [vmem:[%s1069_s26 + $0x4] sm:$0xf0] }
  0x50   : > { %v619_v42 = vor.u32 %v678_v39, %v616_v40  ;;  %v676_v45 = vld [vmem:[%s1069_s26 + $0x4] sm:$0xf]  ;;  %v608_v46 = vld [vmem:[%s1069_s26 + $0x8] sm:$0xf0]  ;;  %v607_v47 = vor.u32 %v677_v44, %v606_v43  ;;  %v267_v48 = vld [vmem:[%s1062_s10] sm:$0x3] }
  0x51   : > { %367 = vmatpush.bf16.msra.mxu0 %v647_v17  ;;  %v611_v49 = vor.u32 %v676_v45, %v608_v46  ;;  %v268_v50 = vpack.c.bf16 %v267_v48, %v267_v48  ;;  %vm394_vm0 = vcmask 1041408   ;;  %v266_v53 = vld [vmem:[#allocation8] sm:$0xf]  ;;  %p668_p1 = scmp.ne.s32.totalorder %s984_s19, 3 }
  0x52   : > { %380 = vmatpush.bf16.msra.mxu1 %v651_v18 }
  0x55   : > { %368 = vmatpush.bf16.msra.mxu0 %v639_v23 }
  0x56   : > { %381 = vmatpush.bf16.msra.mxu1 %v643_v24 }
  0x59   : > { %369 = vmatpush.bf16.msra.mxu0 %v631_v29 }
  0x5a   : > { %382 = vmatpush.bf16.msra.mxu1 %v635_v30 }
  0x5d   : > { %370 = vmatpush.bf16.msra.mxu0 %v623_v35 }
  0x5e   : > { %383 = vmatpush.bf16.msra.mxu1 %v627_v36 }
  0x61   : > { %371 = vmatpush.bf16.msra.mxu0 %v615_v41 }
  0x62   : > { %384 = vmatpush.bf16.msra.mxu1 %v619_v42 }
  0x65   : > { %372 = vmatpush.bf16.msra.mxu0 %v607_v47 }
  0x66   : > { %385 = vmatpush.bf16.msra.mxu1 %v611_v49 }
  0x68   : > { %373 = vmatmul.bf16.vlgmr.msra.gmra.mxu0 %v268_v50 }
  0x69   : > { %386 = vmatmul.bf16.vlgmr.msra.gmra.mxu1 %v268_v50 }
  0xe5   : > { %v374_v51 = vpop.f32.mrf.mxu0 }
  0xe6   : > { %v387_v52 = vpop.f32.mrf.mxu1 }
  0xe7   : > { %v393_v54 = vrot.slane %v387_v52, 6 }
  0xe9   : > { %v395_v55 = vsel %vm394_vm0, %v374_v51, %v393_v54 }
  0xea   : > { %v397_v56 = vadd.f32 %v395_v55, %v266_v53  ;;  %402 = sbr.rel (%p668_p1) target bundleno = 567 (0x237), region = 56 }
  0xec   : > { %398 = vst [vmem:[#allocation8] sm:$0xf] %v397_v56 }
  0xed   : > { %v376_v57 = vpop.f32.mrf.mxu0 }
  0xee   : > { %v389_v58 = vpop.f32.mrf.mxu1 }
  0xef   : > { %v937_v1 = vmov 256.0   ;;  %v938_v7 = vmov 269488144   ;;  %v404_v26 = vld [vmem:[#allocation7] sm:$0x3] }
  0xf0   : > { %759 = vrcp.f32 %v937_v1  ;;  %v427_v8 = vunpack.c.l.s4 %v938_v7  ;;  %v405_v28 = vld [vmem:[%s1145_s3] sm:$0x3]  ;;  %v465_v29 = vperm.slane %v404_v26, 1  ;;  %v464_v33 = vperm.slane %v404_v26, 0 }
  0xf1   : > { %v472_v31 = vperm.slane %v405_v28, 1  ;;  %v471_v36 = vperm.slane %v405_v28, 0 }
  0xf2   : > { %v428_v10 = vunpack.c.0.s8 %v427_v8  ;;  %v466_v34 = vrot.slane %v465_v29, 6 }
  0xf3   : > { %v403_v59 = vld [vmem:[#allocation8] sm:$0xf]  ;;  %v473_v37 = vrot.slane %v472_v31, 6 }
  0xf4   : > { %407 = vst [vmem:[#allocation1] ss:$4 sm:$0xff] %v403_v59  ;;  %v467_v40 = vsel %vm394_vm0, %v464_v33, %v466_v34 }
  0xf5   : > { %v474_v42 = vsel %vm394_vm0, %v471_v36, %v473_v37 }
  0xf6   : > { %v760_v2 = vpop.eup %759 }
  0xf7   : > { %v418_v3 = vmul.f32 256.0, %v760_v2  ;;  %vm422_vm1 = vweird.f32 %v760_v2 }
  0xf9   : > { %v419_v4 = vsub.f32 1.0, %v418_v3 }
  0xfb   : > { %v408_v60 = vld.sshfl [vmem:[#allocation1] sm:$0xff pattern:$0x73625140]  ;;  %v409_v61 = vld.sshfl [vmem:[#allocation1 + $0x8] sm:$0xff pattern:$0x73625140]  ;;  %v420_v5 = vmul.f32 %v760_v2, %v419_v4 }
  0xfc   : > { %v412_v62 = vsel %vm394_vm0, %v408_v60, 0.0  ;;  %v413_v63 = vsel %vm394_vm0, %v409_v61, 0.0 }
  0xfd   : > { %v414_v0 = vadd.f32 %v413_v63, %v412_v62  ;;  %v421_v6 = vadd.f32 %v760_v2, %v420_v5 }
  0xff   : > { %415 = vadd.xlane.f32.xlu0 %v414_v0  ;;  %v423_v9 = vsel %vm422_vm1, %v760_v2, %v421_v6 }
 0x172   : > { %v416_v11 = vpop.xlane.xlu0 %415 }
 0x173   : > { %v424_v12 = vmul.f32 %v423_v9, %v416_v11 }
 0x175   : > { %v429_v13 = vperm.slane %v424_v12, %v428_v10 }
 0x177   : > { %v431_v14 = vsub.f32 %v403_v59, %v429_v13 }
 0x179   : > { %v432_v15 = vmul.f32 %v431_v14, %v431_v14 }
 0x17b   : > { %434 = vst [vmem:[#allocation1] ss:$4 sm:$0xff] %v432_v15 }
 0x182   : > { %v435_v16 = vld.sshfl [vmem:[#allocation1] sm:$0xff pattern:$0x73625140]  ;;  %v436_v17 = vld.sshfl [vmem:[#allocation1 + $0x8] sm:$0xff pattern:$0x73625140] }
 0x183   : > { %v439_v18 = vsel %vm394_vm0, %v435_v16, 0.0  ;;  %v440_v19 = vsel %vm394_vm0, %v436_v17, 0.0 }
 0x184   : > { %v441_v20 = vadd.f32 %v440_v19, %v439_v18 }
 0x186   : > { %442 = vadd.xlane.f32.xlu0 %v441_v20 }
 0x1f9   : > { %v443_v21 = vpop.xlane.xlu0 %442 }
 0x1fa   : > { %v444_v22 = vmul.f32 %v443_v21, %v423_v9 }
 0x1fc   : > { %v445_v23 = vadd.f32 1e-05, %v444_v22 }
 0x1fe   : > { %761 = vrsqrt.f32 %v445_v23  ;;  %vm452_vm3 = vweird.f32 %v445_v23 }
 0x204   : > { %v762_v24 = vpop.eup %761 }
 0x205   : > { %v447_v25 = vmul.f32 %v762_v24, %v445_v23  ;;  %vm453_vm2 = vweird.f32 %v762_v24 }
 0x206   : > { %vm454_vm4 = vmor %vm452_vm3, %vm453_vm2 }
 0x207   : > { %v448_v27 = vmul.f32 %v762_v24, %v447_v25 }
 0x209   : > { %v449_v30 = vmul.f32 0.5, %v448_v27 }
 0x20b   : > { %v450_v32 = vsub.f32 1.5, %v449_v30 }
 0x20d   : > { %v451_v35 = vmul.f32 %v762_v24, %v450_v32 }
 0x20f   : > { %v455_v38 = vsel %vm454_vm4, %v762_v24, %v451_v35 }
 0x210   : > { %v460_v39 = vperm.slane %v455_v38, %v428_v10 }
 0x212   : > { %v462_v41 = vmul.f32 %v460_v39, %v431_v14 }
 0x214   : > { %v469_v43 = vmul.f32 %v467_v40, %v462_v41 }
 0x216   : > { %v476_v44 = vadd.f32 %v474_v42, %v469_v43 }
 0x218   : > { %v669_v45 = vmul.f32 -1.442695, %v476_v44 }
 0x21a   : > { %763 = vpow2.f32 %v669_v45 }
 0x220   : > { %v764_v46 = vpop.eup %763 }
 0x221   : > { %v480_v47 = vadd.f32 1.0, %v764_v46 }
 0x223   : > { %765 = vrcp.f32 %v480_v47  ;;  %v492_v51 = vand.u32 2147483648, %v480_v47  ;;  %v490_v53 = vand.u32 2147483647, %v480_v47  ;;  %vm486_vm6 = vweird.f32 %v480_v47 }
 0x225   : > { %v493_v55 = vor.u32 1.1754944e-38, %v492_v51  ;;  %vm491_vm8 = vcmp.eq.f32.partialorder %v490_v53, 8.507059e+37 }
 0x229   : > { %v766_v48 = vpop.eup %765 }
 0x22a   : > { %v482_v49 = vmul.f32 %v766_v48, %v480_v47  ;;  %vm487_vm5 = vweird.f32 %v766_v48 }
 0x22b   : > { %vm488_vm7 = vmor %vm486_vm6, %vm487_vm5 }
 0x22c   : > { %v483_v50 = vsub.f32 1.0, %v482_v49 }
 0x22e   : > { %v484_v52 = vmul.f32 %v766_v48, %v483_v50 }
 0x230   : > { %v485_v54 = vadd.f32 %v766_v48, %v484_v52 }
 0x232   : > { %v489_v56 = vsel %vm488_vm7, %v766_v48, %v485_v54 }
 0x233   : > { %v494_v57 = vsel %vm491_vm8, %v493_v55, %v489_v56 }
 0x234   : > { %v496_v58 = vmul.f32 %v494_v57, %v476_v44 }
 0x236   : > { %497 = vst [vmem:[#allocation8] sm:$0xf] %v496_v58 }
 0x237 PF: > { %p718_p4 = scmp.eq.s32.totalorder %s984_s19, 3  ;;  %s939_s28 = smov [#allocation8]  }
 0x238   : > { %s504_s23 = sshll.u32 %s939_s28, 4  ;;  %s506_s12 = sshll.u32 %s1146_s4, 4  ;;  %s505_s23 = int_to_ptr.vmem [resolvable:$true] %s504_s23  ;;  %s507_s12 = int_to_ptr.hbm [resolvable:$true] %s506_s12 }
 0x239   : > { %701 = dma.vmem_to_hbm [thread:$0]  (%p718_p4), %s505_s23, 64, %s507_s12, [#allocation4]  }
 0x23a   : > { %914 = dma.done.wait (%p718_p4), [#allocation4], 64  }
 0x23b   : > { %916 = vsyncadd (%p718_p4), [#allocation4], 4294967232 }
 0x23c PF: > { %p18_p5 = scmp.ge.s32.totalorder %s1009_s27, 6   ;;  %s1150_s15 = smov %s923_s16 }
 0x23d   : > { %s1151_s16 = smov %s927_s17  ;;  %s1152_s17 = smov %s1019_s30 }
 0x23e   : > { %s1153_s18 = smov %s1009_s27  ;;  %20 = sbr.rel (!%p18_p5) target bundleno = 6 (0x6), region = 98 }
 0x243   :  { %520 = vsyncpa [#allocation3], 1 }
 0x244   :  { %522 = vsyncpa [#allocation3 + $0x1], 1 }
 0x245   :  { %523 = vsyncpa [#allocation6], 1 }
 0x246   :  { %525 = vsyncpa [#allocation6 + $0x1], 1 }
 0x247   :  { %526 = vsyncpa [#allocation4], 1 }
 0x248   :  { %528 = vsyncpa [#allocation4 + $0x1], 1 }

</bundles_post_ra>
